<compile_context>
chip_gen: v7x
topology: tpu7x:2x2x1
jax: 0.10.0
libtpu: 0.0.40
codegen_flags: <defaults>
</compile_context>

<pallas_src>
import functools

import jax
import jax.numpy as jnp
from jax import lax
from jax.experimental import pallas as pl
from jax.experimental.pallas import tpu as pltpu


# -----------------------------------------------------------------------------
# Fused kernel: [conv1+bn1 | 1x1 shortcut+bn] -> relu -> conv2+bn2 -> add -> relu
# One batch element per grid step.
#
#   xp_ref  : (1, Cin, Lp)       zero-padded, flattened input image    (bf16)
#   mask_ref: (1, Lc)            1.0 at valid strip positions else 0.0 (f32)
#   ws_ref  : (2*Cout, 9*Cin)    [conv1 ; shortcut@center-tap], BN-folded (bf16)
#   b1_ref  : (Cout, 1)          folded BN1 bias                       (f32)
#   w2_ref  : (Cout, 9*Cout)     conv2 weights, BN2 scale folded       (bf16)
#   b2sc_ref: (Cout, 1)          folded (BN2 + BNsc) bias              (f32)
#   o_ref   : (1, Cout, Lout)    padded, flattened output, Lout%128==0 (f32)
# -----------------------------------------------------------------------------
def residual_block_kernel(H, W, xp_ref, mask_ref, ws_ref, b1_ref,
                          w2_ref, b2sc_ref, o_ref):
    Wp = W + 2
    Lc = H * Wp - 2            # contiguous "strip" covering all interior pixels
    Cout = o_ref.shape[1]
    Lout = o_ref.shape[2]

    xp = xp_ref[0]             # (Cin, Lp) bf16
    mask = mask_ref[...]       # (1, Lc)   f32

    def im2col(buf):           # bf16 (C, Lp) -> (9*C, Lc); taps in (dy, dx) order
        taps = [buf[:, dy * Wp + dx: dy * Wp + dx + Lc]
                for dy in range(3) for dx in range(3)]
        return jnp.concatenate(taps, axis=0)

    def matmul(w, patches):    # bf16 MXU, f32 accumulate
        return lax.dot_general(
            w, patches,
            dimension_numbers=(((1,), (0,)), ((), ())),
            preferred_element_type=jnp.float32)

    # ---- conv1 (+BN1) and 1x1 shortcut (+BNsc scale) in ONE matmul ----------
    both = matmul(ws_ref[...], im2col(xp))            # (2*Cout, Lc) f32
    # Mask zeroes the strip wrap positions so the re-padded hp is exactly the
    # zero-padded activation.
    h = jnp.maximum(both[:Cout] + b1_ref[...], 0.0) * mask
    sc = both[Cout:]                                  # shortcut (bias deferred)

    zb = jnp.zeros((Cout, Wp + 1), jnp.bfloat16)
    hp = jnp.concatenate([zb, h.astype(jnp.bfloat16), zb], axis=1)  # (Cout, Lp)

    # ---- conv2 (+ folded BN2) ------------------------------------------------
    left = matmul(w2_ref[...], im2col(hp))            # (Cout, Lc) f32

    # ---- residual add, single combined bias, ReLU, zero wrap columns --------
    out = jnp.maximum(left + sc + b2sc_ref[...], 0.0) * mask

    # Lane-dense (Lout % 128 == 0) store of the padded, flattened output.
    zf_front = jnp.zeros((Cout, Wp + 1), jnp.float32)
    zf_back = jnp.zeros((Cout, Lout - Lc - (Wp + 1)), jnp.float32)
    o_ref[0] = jnp.concatenate([zf_front, out, zf_back], axis=1)


# -----------------------------------------------------------------------------
# Parameter prep: fold BN scale into conv weights, reshape to matmul form,
# stack the shortcut into conv1's center-tap columns, combine trailing biases.
# -----------------------------------------------------------------------------
def _fold_bn(w_mat, bn, eps=1e-5):
    gamma, beta, mean, var = bn
    scale = gamma / jnp.sqrt(var + eps)                       # (Cout,)
    bias = beta - mean * scale
    w_folded = (w_mat * scale[:, None]).astype(jnp.bfloat16)  # fold scale, bf16
    return w_folded, bias.reshape(-1, 1).astype(jnp.float32)


def _oihw_to_mat(w):  # (Cout, Cin, 3, 3) -> (Cout, 9*Cin); columns = (dy,dx,cin)
    co, ci, kh, kw = w.shape
    return jnp.transpose(w, (0, 2, 3, 1)).reshape(co, kh * kw * ci)


def prepare_params(params):
    cout, cin = params["w1"].shape[:2]
    w1m, b1 = _fold_bn(_oihw_to_mat(params["w1"]), params["bn1"])
    w2m, b2 = _fold_bn(_oihw_to_mat(params["w2"]), params["bn2"])
    wscm, bsc = _fold_bn(params["wsc"].reshape(cout, cin), params["bnsc"])

    # Shortcut folded into conv1: its 1x1 kernel occupies the center-tap
    # (dy=1, dx=1) columns of the (dy, dx, cin) im2col weight layout.
    wsc_rows = jnp.zeros((cout, 9 * cin), jnp.bfloat16)
    wsc_rows = wsc_rows.at[:, 4 * cin:5 * cin].set(wscm)
    ws = jnp.concatenate([w1m, wsc_rows], axis=0)             # (2*Cout, 9*Cin)

    return dict(ws=ws, b1=b1, w2m=w2m, b2sc=b2 + bsc,
                # individual pieces kept for the matched-precision reference
                w1m=w1m, wscm=wscm, b2=b2, bsc=bsc)


# -----------------------------------------------------------------------------
# Wrapper
# -----------------------------------------------------------------------------
def residual_block_pallas(x_nchw, params):
    """x_nchw: (N, Cin, H, W) float32 -> (N, Cout, H, W) float32."""
    N, Cin, H, W = x_nchw.shape
    prep = prepare_params(params)
    Cout = prep["w2m"].shape[0]
    Hp, Wp = H + 2, W + 2
    Lp = Hp * Wp
    Lc = H * Wp - 2
    Lout = ((Lp + 127) // 128) * 128          # lane-dense output extent

    # Only wrapper-side prep: cast to bf16 FIRST (halves the pad pass and the
    # input DMA), then pad + flatten.  The intermediate activation never
    # leaves VMEM.
    xp = jnp.pad(x_nchw.astype(jnp.bfloat16),
                 ((0, 0), (0, 0), (1, 1), (1, 1))).reshape(N, Cin, Lp)

    # Strip-validity mask: strip position s is a real pixel iff (s % Wp) < W.
    mask = ((jnp.arange(Lc) % Wp) < W).astype(jnp.float32).reshape(1, Lc)

    flops = 2 * N * Lc * (2 * Cout * 9 * Cin + Cout * 9 * Cout)
    bytes_accessed = (
        xp.size * 2 + N * Cout * Lout * 4 + mask.size * 4
        + (prep["ws"].size + prep["w2m"].size) * 2
        + (prep["b1"].size + prep["b2sc"].size) * 4)

    out_flat = pl.pallas_call(
        functools.partial(residual_block_kernel, H, W),
        out_shape=jax.ShapeDtypeStruct((N, Cout, Lout), jnp.float32),
        grid=(N,),
        in_specs=[
            pl.BlockSpec((1, Cin, Lp), lambda n: (n, 0, 0)),
            pl.BlockSpec((1, Lc), lambda n: (0, 0)),
            pl.BlockSpec((2 * Cout, 9 * Cin), lambda n: (0, 0)),
            pl.BlockSpec((Cout, 1), lambda n: (0, 0)),
            pl.BlockSpec((Cout, 9 * Cout), lambda n: (0, 0)),
            pl.BlockSpec((Cout, 1), lambda n: (0, 0)),
        ],
        out_specs=pl.BlockSpec((1, Cout, Lout), lambda n: (n, 0, 0)),
        compiler_params=pltpu.CompilerParams(dimension_semantics=("parallel",)),
        cost_estimate=pl.CostEstimate(flops=flops, transcendentals=0,
                                      bytes_accessed=bytes_accessed),
    )(xp, mask, prep["ws"], prep["b1"], prep["w2m"], prep["b2sc"])

    # Drop the zero ring + lane tail.  (When chaining residual blocks, consume
    # the padded (N, Cout, Lout) layout directly instead — wrap columns are
    # already zeroed in-kernel — to skip this extra HBM pass.)
    return out_flat[:, :, :Lp].reshape(N, Cout, Hp, Wp)[:, :, 1:-1, 1:-1]


# -----------------------------------------------------------------------------
# References
# -----------------------------------------------------------------------------
def residual_block_ref_f32(x, params, eps=1e-5):
    """Exact float32 semantics of the PyTorch module (eval mode)."""
    def conv(x_, w):
        return lax.conv_general_dilated(
            x_, w, (1, 1), "SAME", dimension_numbers=("NCHW", "OIHW", "NCHW"))

    def bn(x_, p):
        gamma, beta, mean, var = (v.reshape(1, -1, 1, 1) for v in p)
        return (x_ - mean) / jnp.sqrt(var + eps) * gamma + beta

    left = jnp.maximum(bn(conv(x, params["w1"]), params["bn1"]), 0.0)
    left = bn(conv(left, params["w2"]), params["bn2"])
    short = bn(conv(x, params["wsc"]), params["bnsc"])
    return jnp.maximum(left + short, 0.0)


def residual_block_ref_matched(x, prep):
    """Same math as the kernel (folded BN, bf16 MXU operands, f32 accumulate),
    expressed with XLA convs — the tight correctness check."""
    cin = x.shape[1]
    co = prep["w1m"].shape[0]

    def conv3(xb, w_mat, ci):
        w = jnp.transpose(w_mat.reshape(co, 3, 3, ci), (0, 3, 1, 2))  # OIHW bf16
        return lax.conv_general_dilated(
            xb, w, (1, 1), "SAME", dimension_numbers=("NCHW", "OIHW", "NCHW"),
            preferred_element_type=jnp.float32)

    xb = x.astype(jnp.bfloat16)
    h = jnp.maximum(conv3(xb, prep["w1m"], cin)
                    + prep["b1"].reshape(1, co, 1, 1), 0.0)
    left = conv3(h.astype(jnp.bfloat16), prep["w2m"], co) \
        + prep["b2"].reshape(1, co, 1, 1)
    sc = lax.conv_general_dilated(
        xb, prep["wscm"].reshape(co, cin, 1, 1), (1, 1), "SAME",
        dimension_numbers=("NCHW", "OIHW", "NCHW"),
        preferred_element_type=jnp.float32) + prep["bsc"].reshape(1, co, 1, 1)
    return jnp.maximum(left + sc, 0.0)


def make_params(key, cin, cout):
    ks = jax.random.split(key, 6)

    def bn_params(k):
        k1, k2, k3, k4 = jax.random.split(k, 4)
        return (jax.random.uniform(k1, (cout,), jnp.float32, 0.5, 1.5),  # gamma
                0.1 * jax.random.normal(k2, (cout,), jnp.float32),       # beta
                0.1 * jax.random.normal(k3, (cout,), jnp.float32),       # mean
                jax.random.uniform(k4, (cout,), jnp.float32, 0.5, 1.5))  # var

    return {
        "w1": 0.1 * jax.random.normal(ks[0], (cout, cin, 3, 3), jnp.float32),
        "w2": 0.1 * jax.random.normal(ks[1], (cout, cout, 3, 3), jnp.float32),
        "wsc": 0.1 * jax.random.normal(ks[2], (cout, cin, 1, 1), jnp.float32),
        "bn1": bn_params(ks[3]),
        "bn2": bn_params(ks[4]),
        "bnsc": bn_params(ks[5]),
    }


if __name__ == "__main__":
    N, Cin, H, W = 2, 4, 16, 16
    Cout = 8                                   # Cin != Cout -> projection shortcut
    key = jax.random.PRNGKey(0)
    kx, kp = jax.random.split(key)

    x = jax.random.normal(kx, (N, Cin, H, W), jnp.float32)   # PyTorch NCHW input
    params = make_params(kp, Cin, Cout)

    fwd = jax.jit(residual_block_pallas)       # fuse cast/pad prep + output slice
    out = jax.block_until_ready(fwd(x, params))
    assert out.shape == (N, Cout, H, W)

    # Tight check against a reference doing the identical math (folded BN,
    # bf16 MXU operands, f32 accumulation).
    ref_matched = residual_block_ref_matched(x, prepare_params(params))
    assert jnp.allclose(out, ref_matched, atol=2e-2, rtol=2e-2), \
        "mismatch vs matched-precision reference"

    # Loose check against the pure-f32 module semantics (kernel uses bf16 MXU
    # inputs, so a small drift is expected).
    ref_f32 = residual_block_ref_f32(x, params)
    assert jnp.allclose(out, ref_f32, atol=1e-1, rtol=1e-1), \
        "mismatch vs f32 reference"

    print("KERNEL_OK")
</pallas_src>

<mosaic_0001>
module attributes {stable_mosaic.version = 11 : i64} {
  func.func @residual_block_kernel(%arg0: i32, %arg1: memref<1x4x324xbf16, #tpu.memory_space<vmem>>, %arg2: memref<1x286xf32, #tpu.memory_space<vmem>>, %arg3: memref<16x36xbf16, #tpu.memory_space<vmem>>, %arg4: memref<8x1xf32, #tpu.memory_space<vmem>>, %arg5: memref<8x72xbf16, #tpu.memory_space<vmem>>, %arg6: memref<8x1xf32, #tpu.memory_space<vmem>>, %arg7: memref<1x8x384xf32, #tpu.memory_space<vmem>>) attributes {dimension_semantics = [#tpu.dimension_semantics<parallel>], iteration_bounds = array<i64: 2>, scalar_prefetch = 0 : i64, scratch_operands = 0 : i64, tpu.core_type = #tpu.core_type<tc>, window_params = [{transform_indices = @transform_0, window_bounds = array<i64: 1, 4, 324>}, {pipeline_mode = #tpu.pipeline_mode<synchronous>, transform_indices = @transform_1, window_bounds = array<i64: 1, 286>}, {pipeline_mode = #tpu.pipeline_mode<synchronous>, transform_indices = @transform_2, window_bounds = array<i64: 16, 36>}, {pipeline_mode = #tpu.pipeline_mode<synchronous>, transform_indices = @transform_3, window_bounds = array<i64: 8, 1>}, {pipeline_mode = #tpu.pipeline_mode<synchronous>, transform_indices = @transform_4, window_bounds = array<i64: 8, 72>}, {pipeline_mode = #tpu.pipeline_mode<synchronous>, transform_indices = @transform_5, window_bounds = array<i64: 8, 1>}, {transform_indices = @transform_6, window_bounds = array<i64: 1, 8, 384>}]} {
    %c0 = arith.constant 0 : index
    %c0_0 = arith.constant 0 : index
    %c0_1 = arith.constant 0 : index
    %0 = vector.load %arg1[%c0, %c0_0, %c0_1] : memref<1x4x324xbf16, #tpu.memory_space<vmem>>, vector<1x4x324xbf16>
    %1 = vector.shape_cast %0 : vector<1x4x324xbf16> to vector<4x324xbf16>
    %c0_2 = arith.constant 0 : index
    %c0_3 = arith.constant 0 : index
    %2 = vector.load %arg2[%c0_2, %c0_3] : memref<1x286xf32, #tpu.memory_space<vmem>>, vector<1x286xf32>
    %c0_4 = arith.constant 0 : index
    %c0_5 = arith.constant 0 : index
    %3 = vector.load %arg3[%c0_4, %c0_5] : memref<16x36xbf16, #tpu.memory_space<vmem>>, vector<16x36xbf16>
    %4 = vector.extract_strided_slice %1 {offsets = [0, 0], sizes = [4, 286], strides = [1, 1]} : vector<4x324xbf16> to vector<4x286xbf16>
    %5 = vector.extract_strided_slice %1 {offsets = [0, 1], sizes = [4, 286], strides = [1, 1]} : vector<4x324xbf16> to vector<4x286xbf16>
    %6 = vector.extract_strided_slice %1 {offsets = [0, 2], sizes = [4, 286], strides = [1, 1]} : vector<4x324xbf16> to vector<4x286xbf16>
    %7 = vector.extract_strided_slice %1 {offsets = [0, 18], sizes = [4, 286], strides = [1, 1]} : vector<4x324xbf16> to vector<4x286xbf16>
    %8 = vector.extract_strided_slice %1 {offsets = [0, 19], sizes = [4, 286], strides = [1, 1]} : vector<4x324xbf16> to vector<4x286xbf16>
    %9 = vector.extract_strided_slice %1 {offsets = [0, 20], sizes = [4, 286], strides = [1, 1]} : vector<4x324xbf16> to vector<4x286xbf16>
    %10 = vector.extract_strided_slice %1 {offsets = [0, 36], sizes = [4, 286], strides = [1, 1]} : vector<4x324xbf16> to vector<4x286xbf16>
    %11 = vector.extract_strided_slice %1 {offsets = [0, 37], sizes = [4, 286], strides = [1, 1]} : vector<4x324xbf16> to vector<4x286xbf16>
    %12 = vector.extract_strided_slice %1 {offsets = [0, 38], sizes = [4, 286], strides = [1, 1]} : vector<4x324xbf16> to vector<4x286xbf16>
    %13 = tpu.concatenate %4, %5, %6, %7, %8, %9, %10, %11, %12 in 0 : vector<4x286xbf16>, vector<4x286xbf16>, vector<4x286xbf16>, vector<4x286xbf16>, vector<4x286xbf16>, vector<4x286xbf16>, vector<4x286xbf16>, vector<4x286xbf16>, vector<4x286xbf16> -> vector<36x286xbf16>
    %cst = arith.constant dense<0.000000e+00> : vector<16x286xf32>
    %14 = tpu.matmul %3, %13, %cst {dimension_numbers = #tpu.dot_dimension_numbers<[1], [0], [0], [1], [0, 0, 1, 1], [], []>} : vector<16x36xbf16>, vector<36x286xbf16>, vector<16x286xf32> -> vector<16x286xf32>
    %15 = vector.extract_strided_slice %14 {offsets = [0, 0], sizes = [8, 286], strides = [1, 1]} : vector<16x286xf32> to vector<8x286xf32>
    %c0_6 = arith.constant 0 : index
    %c0_7 = arith.constant 0 : index
    %16 = vector.load %arg4[%c0_6, %c0_7] : memref<8x1xf32, #tpu.memory_space<vmem>>, vector<8x1xf32>
    %17 = vector.broadcast %16 : vector<8x1xf32> to vector<8x286xf32>
    %18 = arith.addf %15, %17 : vector<8x286xf32>
    %cst_8 = arith.constant 0.000000e+00 : f32
    %19 = vector.broadcast %cst_8 : f32 to vector<8x286xf32>
    %20 = arith.maximumf %18, %19 : vector<8x286xf32>
    %21 = vector.broadcast %2 : vector<1x286xf32> to vector<8x286xf32>
    %22 = arith.mulf %20, %21 : vector<8x286xf32>
    %23 = vector.extract_strided_slice %14 {offsets = [8, 0], sizes = [8, 286], strides = [1, 1]} : vector<16x286xf32> to vector<8x286xf32>
    %cst_9 = arith.constant 0.000000e+00 : bf16
    %24 = vector.broadcast %cst_9 : bf16 to vector<8x19xbf16>
    %25 = arith.truncf %22 : vector<8x286xf32> to vector<8x286xbf16>
    %26 = tpu.concatenate %24, %25, %24 in 1 : vector<8x19xbf16>, vector<8x286xbf16>, vector<8x19xbf16> -> vector<8x324xbf16>
    %c0_10 = arith.constant 0 : index
    %c0_11 = arith.constant 0 : index
    %27 = vector.load %arg5[%c0_10, %c0_11] : memref<8x72xbf16, #tpu.memory_space<vmem>>, vector<8x72xbf16>
    %28 = vector.extract_strided_slice %26 {offsets = [0, 0], sizes = [8, 286], strides = [1, 1]} : vector<8x324xbf16> to vector<8x286xbf16>
    %29 = vector.extract_strided_slice %26 {offsets = [0, 1], sizes = [8, 286], strides = [1, 1]} : vector<8x324xbf16> to vector<8x286xbf16>
    %30 = vector.extract_strided_slice %26 {offsets = [0, 2], sizes = [8, 286], strides = [1, 1]} : vector<8x324xbf16> to vector<8x286xbf16>
    %31 = vector.extract_strided_slice %26 {offsets = [0, 18], sizes = [8, 286], strides = [1, 1]} : vector<8x324xbf16> to vector<8x286xbf16>
    %32 = vector.extract_strided_slice %26 {offsets = [0, 19], sizes = [8, 286], strides = [1, 1]} : vector<8x324xbf16> to vector<8x286xbf16>
    %33 = vector.extract_strided_slice %26 {offsets = [0, 20], sizes = [8, 286], strides = [1, 1]} : vector<8x324xbf16> to vector<8x286xbf16>
    %34 = vector.extract_strided_slice %26 {offsets = [0, 36], sizes = [8, 286], strides = [1, 1]} : vector<8x324xbf16> to vector<8x286xbf16>
    %35 = vector.extract_strided_slice %26 {offsets = [0, 37], sizes = [8, 286], strides = [1, 1]} : vector<8x324xbf16> to vector<8x286xbf16>
    %36 = vector.extract_strided_slice %26 {offsets = [0, 38], sizes = [8, 286], strides = [1, 1]} : vector<8x324xbf16> to vector<8x286xbf16>
    %37 = tpu.concatenate %28, %29, %30, %31, %32, %33, %34, %35, %36 in 0 : vector<8x286xbf16>, vector<8x286xbf16>, vector<8x286xbf16>, vector<8x286xbf16>, vector<8x286xbf16>, vector<8x286xbf16>, vector<8x286xbf16>, vector<8x286xbf16>, vector<8x286xbf16> -> vector<72x286xbf16>
    %cst_12 = arith.constant dense<0.000000e+00> : vector<8x286xf32>
    %38 = tpu.matmul %27, %37, %cst_12 {dimension_numbers = #tpu.dot_dimension_numbers<[1], [0], [0], [1], [0, 0, 1, 1], [], []>} : vector<8x72xbf16>, vector<72x286xbf16>, vector<8x286xf32> -> vector<8x286xf32>
    %39 = arith.addf %38, %23 : vector<8x286xf32>
    %c0_13 = arith.constant 0 : index
    %c0_14 = arith.constant 0 : index
    %40 = vector.load %arg6[%c0_13, %c0_14] : memref<8x1xf32, #tpu.memory_space<vmem>>, vector<8x1xf32>
    %41 = vector.broadcast %40 : vector<8x1xf32> to vector<8x286xf32>
    %42 = arith.addf %39, %41 : vector<8x286xf32>
    %cst_15 = arith.constant 0.000000e+00 : f32
    %43 = vector.broadcast %cst_15 : f32 to vector<8x286xf32>
    %44 = arith.maximumf %42, %43 : vector<8x286xf32>
    %45 = vector.broadcast %2 : vector<1x286xf32> to vector<8x286xf32>
    %46 = arith.mulf %44, %45 : vector<8x286xf32>
    %cst_16 = arith.constant 0.000000e+00 : f32
    %47 = vector.broadcast %cst_16 : f32 to vector<8x19xf32>
    %cst_17 = arith.constant 0.000000e+00 : f32
    %48 = vector.broadcast %cst_17 : f32 to vector<8x79xf32>
    %49 = tpu.concatenate %47, %46, %48 in 1 : vector<8x19xf32>, vector<8x286xf32>, vector<8x79xf32> -> vector<8x384xf32>
    %c0_18 = arith.constant 0 : index
    %c0_19 = arith.constant 0 : index
    %c0_20 = arith.constant 0 : index
    %50 = vector.load %arg7[%c0_18, %c0_19, %c0_20] : memref<1x8x384xf32, #tpu.memory_space<vmem>>, vector<1x8x384xf32>
    %51 = vector.shape_cast %50 : vector<1x8x384xf32> to vector<8x384xf32>
    %52 = vector.shape_cast %49 : vector<8x384xf32> to vector<1x8x384xf32>
    tpu.vector_store %arg7[%c0_18, %c0_19, %c0_20], %52 {strides = array<i32>} : memref<1x8x384xf32, #tpu.memory_space<vmem>>, vector<1x8x384xf32>,
    return
  }
  func.func @transform_0(%arg0: i32) -> (i32, i32, i32) {
    %c0_i32 = arith.constant 0 : i32
    %c0_i32_0 = arith.constant 0 : i32
    %c0_i32_1 = arith.constant 0 : i32
    return %arg0, %c0_i32, %c0_i32_0 : i32, i32, i32
  }
  func.func @transform_1(%arg0: i32) -> (i32, i32) {
    %c0_i32 = arith.constant 0 : i32
    %c0_i32_0 = arith.constant 0 : i32
    %c0_i32_1 = arith.constant 0 : i32
    return %c0_i32, %c0_i32_0 : i32, i32
  }
  func.func @transform_2(%arg0: i32) -> (i32, i32) {
    %c0_i32 = arith.constant 0 : i32
    %c0_i32_0 = arith.constant 0 : i32
    %c0_i32_1 = arith.constant 0 : i32
    return %c0_i32, %c0_i32_0 : i32, i32
  }
  func.func @transform_3(%arg0: i32) -> (i32, i32) {
    %c0_i32 = arith.constant 0 : i32
    %c0_i32_0 = arith.constant 0 : i32
    %c0_i32_1 = arith.constant 0 : i32
    return %c0_i32, %c0_i32_0 : i32, i32
  }
  func.func @transform_4(%arg0: i32) -> (i32, i32) {
    %c0_i32 = arith.constant 0 : i32
    %c0_i32_0 = arith.constant 0 : i32
    %c0_i32_1 = arith.constant 0 : i32
    return %c0_i32, %c0_i32_0 : i32, i32
  }
  func.func @transform_5(%arg0: i32) -> (i32, i32) {
    %c0_i32 = arith.constant 0 : i32
    %c0_i32_0 = arith.constant 0 : i32
    %c0_i32_1 = arith.constant 0 : i32
    return %c0_i32, %c0_i32_0 : i32, i32
  }
  func.func @transform_6(%arg0: i32) -> (i32, i32, i32) {
    %c0_i32 = arith.constant 0 : i32
    %c0_i32_0 = arith.constant 0 : i32
    %c0_i32_1 = arith.constant 0 : i32
    return %arg0, %c0_i32, %c0_i32_0 : i32, i32, i32
  }
}

</mosaic_0001>

<bundles_post_ra>
// kernel: residual_block_pallas.1
= control target key start
LH: loop header
LB: loop body
LE: loop exit
PB: predicated region body
PF: predicated region fallthrough
CT: control target
= control target key end

     0   :  { %s997_s21 = smov 0   ;;  %s1219_s0 = inlined_call_operand.vmem [shape: bf16[2,4,324], index: 0, kind: input, shape index: {}]   ;;  %s1220_s1 = inlined_call_operand.vmem [shape: f32[1,286], index: 1, kind: input, shape index: {}]   ;;  %s1221_s2 = inlined_call_operand.vmem [shape: bf16[16,36], index: 2, kind: input, shape index: {}]   ;;  %s1222_s3 = inlined_call_operand.vmem [shape: f32[8,1], index: 3, kind: input, shape index: {}]   ;;  %s1223_s4 = inlined_call_operand.vmem [shape: bf16[8,72], index: 4, kind: input, shape index: {}]   ;;  %s1224_s5 = inlined_call_operand.vmem [shape: f32[8,1], index: 5, kind: input, shape index: {}]   ;;  %s1225_s6 = inlined_call_operand.vmem [shape: f32[2,8,384], index: 6, kind: output, shape index: {}]  }
   0x1 LB: > { %s863_s22 = sadd.s32 4294967295, %s947_s21   ;;  %p867_p0 = scmp.ge.s32.totalorder %s947_s21, 1  ;;  %s947_s21 = sphi %s997_s21, %s16_s21  }
   0x2   : > { %p212_p1 = scmp.lt.s32.totalorder %s947_s21, 3 }
   0x4   : > { %p213_p2 = pnand %p867_p0, %p212_p1 }
   0x5   : > { %p242_p3 = scmp.lt.s32.totalorder (!%p213_p2), %s863_s22, 1  ;;  %v262_v0 = vlaneseq (!%p213_p2)  ;;  %v949_v1 = vmov (!%p213_p2), 1983009808   ;;  %s950_s27 = smov (!%p213_p2), 126   ;;  %v952_v11 = vmov (!%p213_p2), 0.0   ;;  %v957_v18 = vmov (!%p213_p2), 0  }
   0x6   : > { %216 = sbr.rel (%p213_p2) target bundleno = 1028 (0x404), region = 44  ;;  %v260_v2 = vunpack.c.l.s4 (!%p213_p2), %v949_v1  ;;  %s951_s28 = smov (!%p213_p2), 127   ;;  %889 = vmatprep.subr.bf16.mxu1 (!%p213_p2), %v952_v11  ;;  %459 = vmatprep.mubr.bf16.mxu0 (!%p213_p2), %v957_v18  ;;  %vm958_vm0 = vmmov (!%p213_p2), 0   ;;  %v511_v19 = vld [vmem:[%s1222_s3] sm:$0xff] (!%p213_p2)  ;;  %vm289_vm1 = vcmask (!%p213_p2), 1039360   ;;  %vm358_vm2 = vcmask (!%p213_p2), 1041408  }
   0x7   : > { %v1007_v3 = vshrl.u32 (!%p213_p2), %v262_v0, 7  ;;  %s953_s29 = smov (!%p213_p2), 110   ;;  %s954_s30 = smov (!%p213_p2), 109   ;;  %895 = vmatprep.mubr.msk.bf16.mxu1 (!%p213_p2), %vm958_vm0, %v952_v11  ;;  %936 = vset.pattern.permute.xlu0 (!%p213_p2), %v957_v18  ;;  %vm310_vm3 = vcmask (!%p213_p2), 900096   ;;  %vm300_vm4 = vcmask (!%p213_p2), 1031168   ;;  %vm375_vm5 = vcmask (!%p213_p2), 1045504  }
   0x8   : > { %v261_v4 = vunpack.c.0.s8 (!%p213_p2), %v260_v2  ;;  %s955_s7 = smov (!%p213_p2), 108   ;;  %s956_s8 = smov (!%p213_p2), 92   ;;  %937 = vset.pattern.permute.xlu1 (!%p213_p2), %v957_v18  ;;  %vm368_vm6 = vcmask (!%p213_p2), 1043456   ;;  %vm328_vm7 = vcmask (!%p213_p2), 883712   ;;  %vm337_vm8 = vcmask (!%p213_p2), 752640  }
   0x9   : > { %s959_s9 = smov (!%p213_p2), 91   ;;  %s960_s10 = smov (!%p213_p2), 90   ;;  %vm319_vm9 = vcmask (!%p213_p2), 891904   ;;  %vm346_vm10 = vcmask (!%p213_p2), 744448   ;;  %vm355_vm11 = vcmask (!%p213_p2), 736256   ;;  %vm414_vm12 = vcmask (!%p213_p2), 293888  }
   0xa   : > { %v264_v5 = vsub.s32 (!%p213_p2), %v261_v4, %v1007_v3  ;;  %s961_s17 = smov (!%p213_p2), 19   ;;  %vm554_vm13 = vcmask (!%p213_p2), 154624   ;;  %vm561_vm14 = vcmask (!%p213_p2), 400384   ;;  %vm680_vm15 = vcmask (!%p213_p2), 588800  }
   0xd   : > { %s1227_s22 = smov (!%p242_p3, %s863_s22), 1 }
   0xe   : > { %s913_s23 = smul.u32 6, %s1227_s22 }
   0xf   : > { %s914_s24 = smul.u32 24, %s1227_s22 }
  0x10   : > { %s246_s26 = scalar_lea.vmem %s1219_s0, %s913_s23 }
  0x11   : > { %v253_v6 = vld [vmem:[%s246_s26] sm:$0x3f] }
  0x12   : > { %v1014_v7 = vrot.slane %v253_v6, %v264_v5  ;;  %v274_v8 = vcombine.low %v253_v6, %v253_v6  ;;  %v258_v10 = vcombine.high %v253_v6, %v253_v6 }
  0x14   : > { %296 = vrot.lane.b32.xlu1 %v1014_v7, %s950_s27  ;;  %287 = vrot.lane.b32.xlu0 %v1014_v7, %s951_s28  ;;  %v281_v9 = vrot.slane %v274_v8, %v264_v5  ;;  %v292_v13 = vcombine.low %v1014_v7, %v1014_v7  ;;  %v272_v14 = vrot.slane %v258_v10, %v264_v5 }
  0x15   : > { %v273_v16 = vcombine.high %v1014_v7, %v1014_v7 }
  0x16   : > { %v282_v12 = vcombine.high %v281_v9, %v281_v9  ;;  %v293_v15 = vcombine.low %v272_v14, %v272_v14  ;;  %v303_v17 = vcombine.low %v281_v9, %v281_v9 }
  0x18   : > { %283 = vrot.lane.b32.xlu1 %v281_v9, %s951_s28  ;;  %306 = vrot.lane.b32.xlu0 %v281_v9, %s953_s29 }
  0x1c   : > { %285 = vrot.lane.b32.xlu0 %v282_v12, %s951_s28  ;;  %294 = vrot.lane.b32.xlu1 %v292_v13, %s950_s27 }
  0x20   : > { %308 = vrot.lane.b32.xlu1 %v292_v13, %s953_s29  ;;  %298 = vrot.lane.b32.xlu0 %v293_v15, %s950_s27 }
  0x24   : > { %315 = vrot.lane.b32.xlu1 %v273_v16, %s954_s30  ;;  %304 = vrot.lane.b32.xlu0 %v303_v17, %s953_s29 }
  0x28   : > { %324 = vrot.lane.b32.xlu1 %v282_v12, %s955_s7  ;;  %317 = vrot.lane.b32.xlu0 %v272_v14, %s954_s30 }
  0x2c   : > { %313 = vrot.lane.b32.xlu1 %v1014_v7, %s954_s30  ;;  %326 = vrot.lane.b32.xlu0 %v1014_v7, %s955_s7 }
  0x30   : > { %333 = vrot.lane.b32.xlu1 %v1014_v7, %s956_s8  ;;  %322 = vrot.lane.b32.xlu0 %v281_v9, %s955_s7 }
  0x34   : > { %331 = vrot.lane.b32.xlu1 %v292_v13, %s956_s8  ;;  %335 = vrot.lane.b32.xlu0 %v293_v15, %s956_s8 }
  0x38   : > { %344 = vrot.lane.b32.xlu1 %v292_v13, %s959_s9  ;;  %342 = vrot.lane.b32.xlu0 %v281_v9, %s959_s9 }
  0x3c   : > { %349 = vrot.lane.b32.xlu1 %v1014_v7, %s960_s10  ;;  %340 = vrot.lane.b32.xlu0 %v303_v17, %s959_s9  ;;  %v940_v17 = vld [vmem:[%s1221_s2] sm:$0xff]  }
  0x40   : > { %353 = vrot.lane.b32.xlu1 %v272_v14, %s960_s10  ;;  %351 = vrot.lane.b32.xlu0 %v273_v16, %s960_s10 }
  0x44   : > { %514 = vperm.xlu0 %936, %v511_v19  }
  0x86   : > { %v297_v20 = vpop.permute.xlu1 %296  ;;  %v288_v21 = vpop.permute.xlu0 %287 }
  0x87   : > { %v367_v28 = vsel %vm358_vm2, %v272_v14, %v288_v21 }
  0x8a   : > { %v284_v22 = vpop.permute.xlu1 %283  ;;  %v307_v23 = vpop.permute.xlu0 %306 }
  0x8e   : > { %v286_v24 = vpop.permute.xlu0 %285  ;;  %v295_v25 = vpop.permute.xlu1 %294 }
  0x8f   : > { %v291_v26 = vsel %vm289_vm1, %v286_v24, %v288_v21  ;;  %v290_v27 = vsel %vm289_vm1, %v284_v22, %v286_v24  ;;  %v301_v36 = vsel %vm300_vm4, %v295_v25, %v297_v20  ;;  %v526_v21 = vsub.s32 0, %v1007_v3  ;;  %v254_v22 = vld [vmem:[%s1220_s1] sm:$0x7] }
  0x90   : > { %v364_v31 = vsel %vm358_vm2, %v273_v16, %v291_v26  ;;  %v361_v35 = vsel %vm358_vm2, %v1014_v7, %v290_v27 }
  0x91   : > { %v370_v43 = vsel %vm368_vm6, %v361_v35, %v301_v36 }
  0x92   : > { %v309_v29 = vpop.permute.xlu1 %308  ;;  %v299_v30 = vpop.permute.xlu0 %298 }
  0x93   : > { %v312_v32 = vsel %vm310_vm3, %v307_v23, %v309_v29  ;;  %v302_v33 = vsel %vm300_vm4, %v297_v20, %v299_v30  ;;  %v374_v34 = vsel %vm368_vm6, %v367_v28, %v299_v30  ;;  %v534_v28 = vsub.s32 2, %v1007_v3 }
  0x94   : > { %v383_v37 = vsel %vm375_vm5, %v374_v34, %v309_v29  ;;  %v372_v38 = vsel %vm368_vm6, %v364_v31, %v302_v33 }
  0x95   : > { %890 = vmatpush3.bf16.msra.mxu1 %v383_v37  ;;  %v380_v39 = vsel %vm375_vm5, %v372_v38, %v312_v32 }
  0x96   : > { %v316_v40 = vpop.permute.xlu1 %315  ;;  %427 = vmatprep.subr.bf16.mxu0 %v380_v39  ;;  %v305_v41 = vpop.permute.xlu0 %304  ;;  %891 = vmatprep.subr.bf16.mxu1 %v952_v11 }
  0x97   : > { %v311_v42 = vsel %vm310_vm3, %v305_v41, %v307_v23  ;;  %v530_v23 = vsub.s32 1, %v1007_v3 }
  0x98   : > { %v377_v44 = vsel %vm375_vm5, %v370_v43, %v311_v42 }
  0x99   : > { %428 = vmatpush1.bf16.msra.mxu0 %v377_v44  ;;  %v1116_v33 = vrot.slane %v254_v22, %v530_v23 }
  0x9a   : > { %v325_v45 = vpop.permute.xlu1 %324  ;;  %v318_v46 = vpop.permute.xlu0 %317 }
  0x9b   : > { %v321_v55 = vsel %vm319_vm9, %v316_v40, %v318_v46 }
  0x9e   : > { %v314_v47 = vpop.permute.xlu1 %313  ;;  %v327_v48 = vpop.permute.xlu0 %326 }
  0x9f   : > { %v330_v53 = vsel %vm328_vm7, %v325_v45, %v327_v48  ;;  %v393_v56 = vsel %vm358_vm2, %v318_v46, %v327_v48  ;;  %v320_v4 = vsel %vm319_vm9, %v314_v47, %v316_v40  ;;  %v1122_v40 = vrot.slane %v254_v22, %v534_v28 }
  0xa0   : > { %v390_v57 = vsel %vm358_vm2, %v321_v55, %v330_v53 }
  0xa2   : > { %v334_v49 = vpop.permute.xlu1 %333  ;;  %v323_v50 = vpop.permute.xlu0 %322 }
  0xa3   : > { %v329_v61 = vsel %vm328_vm7, %v323_v50, %v325_v45 }
  0xa4   : > { %v387_v5 = vsel %vm358_vm2, %v320_v4, %v329_v61 }
  0xa6   : > { %v332_v51 = vpop.permute.xlu1 %331  ;;  %v336_v52 = vpop.permute.xlu0 %335 }
  0xa7   : > { %v339_v54 = vsel %vm337_vm8, %v334_v49, %v336_v52  ;;  %v399_v58 = vsel %vm368_vm6, %v393_v56, %v336_v52  ;;  %v338_v1 = vsel %vm337_vm8, %v332_v51, %v334_v49  ;;  %v774_v56 = vld [vmem:[%s1224_s5] sm:$0xff] }
  0xa8   : > { %v397_v0 = vsel %vm368_vm6, %v390_v57, %v339_v54  ;;  %v395_v9 = vsel %vm368_vm6, %v387_v5, %v338_v1 }
  0xaa   : > { %v345_v59 = vpop.permute.xlu1 %344  ;;  %v343_v60 = vpop.permute.xlu0 %342 }
  0xab   : > { %v348_v62 = vsel %vm346_vm10, %v343_v60, %v345_v59  ;;  %v407_v63 = vsel %vm375_vm5, %v399_v58, %v345_v59 }
  0xac   : > { %892 = vmatpush3.bf16.msra.mxu1 %v407_v63  ;;  %v404_v2 = vsel %vm375_vm5, %v397_v0, %v348_v62 }
  0xad   : > { %429 = vmatprep.subr.bf16.mxu0 %v404_v2  ;;  %893 = vmatprep.subr.bf16.mxu1 %v952_v11 }
  0xae   : > { %v350_v6 = vpop.permute.xlu1 %349  ;;  %v341_v7 = vpop.permute.xlu0 %340 }
  0xaf   : > { %v347_v8 = vsel %vm346_vm10, %v341_v7, %v343_v60 }
  0xb0   : > { %v401_v10 = vsel %vm375_vm5, %v395_v9, %v347_v8 }
  0xb1   : > { %430 = vmatpush1.bf16.msra.mxu0 %v401_v10 }
  0xb2   : > { %v354_v12 = vpop.permute.xlu1 %353  ;;  %v352_v13 = vpop.permute.xlu0 %351 }
  0xb3   : > { %v356_v14 = vsel %vm355_vm11, %v350_v6, %v352_v13  ;;  %v357_v15 = vsel %vm355_vm11, %v352_v13, %v354_v12  ;;  %v425_v16 = vsel %vm358_vm2, %v354_v12, 0 }
  0xb4   : > { %871 = vmatprep.subr.msk.bf16.mxu0 %vm358_vm2, %v357_v15  ;;  %894 = vmatpush3.bf16.msra.mxu1 %v425_v16  ;;  %v419_v19 = vsel %vm358_vm2, %v356_v14, 0 }
  0xb5   : > { %432 = vmatpush1.bf16.msra.mxu0 %v419_v19  ;;  %899 = vmatprep.subr.bf16.mxu1 %v952_v11 }
  0xb7   : > { %896 = vmatmul.mubr.msk.bf16.vlgmr.msra.gmra.mrb[0].mxu1 %vm414_vm12, %v940_v17 }
  0xb8   : > { %872 = vmatmul.mubr.msk.bf16.vlgmr.msra.gmra.mrb[0].mxu0 %vm414_vm12, %v940_v17  ;;  %909 = vmatprep.mubr.msk.bf16.mxu1 %vm958_vm0, %v952_v11 }
  0xb9   : > { %725 = vmatprep.mubr.bf16.mxu0 %v957_v18  ;;  %v1114_v18 = vrot.slane %v254_v22, %v526_v21 }
  0xc3   : > { %v515_v20 = vpop.permute.xlu0 %514 }
 0x18a   : > { %v504_v24 = vpop.f32.mrb[0].mxu1 }
 0x18b   : > { %v461_v25 = vpop.f32.mrb[0].mxu0  ;;  %v519_v26 = vadd.f32 %v515_v20, %v504_v24  ;;  %v897_v27 = vpop.f32.mrb[1].mxu1 }
 0x18c   : > { %v517_v29 = vadd.f32 %v515_v20, %v461_v25  ;;  %v463_v30 = vpop.f32.mrb[1].mxu0  ;;  %v1112_v31 = vpop.f32.mrb[2].mxu1 }
 0x18d   : > { %v518_v32 = vadd.f32 %v515_v20, %v463_v30  ;;  %v1118_v34 = vpop.f32.mrb[2].mxu0  ;;  %v898_v35 = vpop.f32.mrb[3].mxu1  ;;  %v522_v38 = vmax.f32 %v519_v26, 0.0 }
 0x18e   : > { %v520_v36 = vmax.f32 %v517_v29, 0.0  ;;  %v1120_v37 = vpop.f32.mrb[3].mxu0 }
 0x18f   : > { %v521_v39 = vmax.f32 %v518_v32, 0.0  ;;  %v541_v44 = vmul.f32 %v1122_v40, %v522_v38 }
 0x190   : > { %v539_v3 = vmul.f32 %v1114_v18, %v520_v36 }
 0x191   : > { %v540_v41 = vmul.f32 %v1116_v33, %v521_v39  ;;  %v544_v45 = vpack.c.bf16 %v541_v44, %v541_v44 }
 0x192   : > { %v542_v42 = vpack.c.bf16 %v539_v3, %v539_v3 }
 0x193   : > { %v543_v43 = vpack.c.bf16 %v540_v41, %v540_v41 }
 0x194   : > { %548 = vrot.lane.b32.xlu0 %v542_v42, %s961_s17 }
 0x195   : > { %550 = vrot.lane.b32.xlu1 %v543_v43, %s961_s17 }
 0x199   : > { %552 = vrot.lane.b32.xlu1 %v544_v45, %s961_s17 }
 0x206   : > { %v549_v46 = vpop.permute.xlu0 %548 }
 0x207   : > { %v560_v47 = vsel %vm554_vm13, 0, %v549_v46  ;;  %v551_v48 = vpop.permute.xlu1 %550 }
 0x208   : > { %578 = vrot.lane.b32.xlu0 %v560_v47, %s950_s27  ;;  %v567_v49 = vrot.slane %v560_v47, 4  ;;  %v555_v53 = vsel %vm554_vm13, %v549_v46, %v551_v48 }
 0x209   : > { %v568_v54 = vrot.slane %v555_v53, 4 }
 0x20a   : > { %570 = vrot.lane.b32.xlu1 %v567_v49, %s951_s28 }
 0x20b   : > { %v553_v50 = vpop.permute.xlu1 %552 }
 0x20c   : > { %v556_v51 = vsel %vm554_vm13, %v551_v48, %v553_v50  ;;  %594 = vrot.lane.b32.xlu0 %v560_v47, %s954_s30 }
 0x20d   : > { %v563_v52 = vsel %vm561_vm14, %v556_v51, 0  ;;  %v564_v51 = vld [vmem:[%s1223_s4] sm:$0xf] }
 0x20e   : > { %582 = vrot.lane.b32.xlu1 %v563_v52, %s950_s27  ;;  %v569_v55 = vrot.slane %v563_v52, 4 }
 0x210   : > { %580 = vrot.lane.b32.xlu0 %v555_v53, %s950_s27  ;;  %s251_s27 = scalar_lea.vmem %s1225_s6, %s914_s24 }
 0x212   : > { %586 = vrot.lane.b32.xlu1 %v567_v49, %s953_s29 }
 0x214   : > { %596 = vrot.lane.b32.xlu0 %v555_v53, %s954_s30 }
 0x216   : > { %598 = vrot.lane.b32.xlu1 %v563_v52, %s954_s30 }
 0x218   : > { %588 = vrot.lane.b32.xlu0 %v568_v54, %s953_s29 }
 0x21a   : > { %602 = vrot.lane.b32.xlu1 %v567_v49, %s955_s7 }
 0x21c   : > { %604 = vrot.lane.b32.xlu0 %v568_v54, %s955_s7 }
 0x21e   : > { %572 = vrot.lane.b32.xlu1 %v568_v54, %s951_s28 }
 0x220   : > { %574 = vrot.lane.b32.xlu0 %v569_v55, %s951_s28 }
 0x222   : > { %614 = vrot.lane.b32.xlu1 %v563_v52, %s956_s8 }
 0x224   : > { %612 = vrot.lane.b32.xlu0 %v555_v53, %s956_s8 }
 0x226   : > { %590 = vrot.lane.b32.xlu1 %v569_v55, %s953_s29 }
 0x228   : > { %620 = vrot.lane.b32.xlu0 %v568_v54, %s959_s9 }
 0x22a   : > { %606 = vrot.lane.b32.xlu1 %v569_v55, %s955_s7 }
 0x22c   : > { %610 = vrot.lane.b32.xlu0 %v560_v47, %s956_s8 }
 0x22e   : > { %622 = vrot.lane.b32.xlu1 %v569_v55, %s959_s9 }
 0x230   : > { %626 = vrot.lane.b32.xlu0 %v560_v47, %s960_s10 }
 0x232   : > { %618 = vrot.lane.b32.xlu1 %v567_v49, %s959_s9 }
 0x234   : > { %630 = vrot.lane.b32.xlu0 %v563_v52, %s960_s10 }
 0x236   : > { %628 = vrot.lane.b32.xlu1 %v555_v53, %s960_s10 }
 0x23a   : > { %777 = vperm.xlu1 %937, %v774_v56  }
 0x27a   : > { %v579_v57 = vpop.permute.xlu0 %578 }
 0x27c   : > { %v571_v58 = vpop.permute.xlu1 %570 }
 0x27e   : > { %v595_v59 = vpop.permute.xlu0 %594 }
 0x280   : > { %v583_v60 = vpop.permute.xlu1 %582 }
 0x282   : > { %v581_v61 = vpop.permute.xlu0 %580 }
 0x283   : > { %v585_v17 = vsel %vm300_vm4, %v581_v61, %v583_v60  ;;  %v584_v21 = vsel %vm300_vm4, %v579_v57, %v581_v61 }
 0x284   : > { %v587_v62 = vpop.permute.xlu1 %586 }
 0x286   : > { %v597_v63 = vpop.permute.xlu0 %596 }
 0x287   : > { %v600_v30 = vsel %vm319_vm9, %v595_v59, %v597_v63 }
 0x288   : > { %v599_v0 = vpop.permute.xlu1 %598 }
 0x289   : > { %v601_v27 = vsel %vm319_vm9, %v597_v63, %v599_v0 }
 0x28a   : > { %v589_v1 = vpop.permute.xlu0 %588 }
 0x28b   : > { %v592_v15 = vsel %vm310_vm3, %v587_v62, %v589_v1 }
 0x28c   : > { %v603_v2 = vpop.permute.xlu1 %602  ;;  %v646_v24 = vsel %vm368_vm6, %v584_v21, %v592_v15 }
 0x28e   : > { %v605_v4 = vpop.permute.xlu0 %604 }
 0x28f   : > { %v608_v25 = vsel %vm328_vm7, %v603_v2, %v605_v4 }
 0x290   : > { %v573_v5 = vpop.permute.xlu1 %572  ;;  %v658_v36 = vsel %vm368_vm6, %v600_v30, %v608_v25 }
 0x291   : > { %v576_v6 = vsel %vm289_vm1, %v571_v58, %v573_v5 }
 0x292   : > { %v575_v7 = vpop.permute.xlu0 %574  ;;  %v635_v13 = vsel %vm368_vm6, %v560_v47, %v576_v6 }
 0x293   : > { %v577_v8 = vsel %vm289_vm1, %v573_v5, %v575_v7  ;;  %v642_v9 = vsel %vm368_vm6, %v563_v52, %v575_v7 }
 0x294   : > { %900 = vmatpush3.bf16.msra.mxu1 %v642_v9  ;;  %v615_v10 = vpop.permute.xlu1 %614  ;;  %v639_v12 = vsel %vm368_vm6, %v555_v53, %v577_v8 }
 0x295   : > { %693 = vmatprep.subr.bf16.mxu0 %v639_v12  ;;  %901 = vmatprep.subr.bf16.mxu1 %v952_v11 }
 0x296   : > { %v613_v14 = vpop.permute.xlu0 %612  ;;  %694 = vmatpush1.bf16.msra.mxu0 %v635_v13 }
 0x297   : > { %v617_v39 = vsel %vm337_vm8, %v613_v14, %v615_v10 }
 0x298   : > { %v591_v16 = vpop.permute.xlu1 %590 }
 0x299   : > { %v593_v19 = vsel %vm310_vm3, %v589_v1, %v591_v16  ;;  %v654_v20 = vsel %vm368_vm6, %v583_v60, %v591_v16 }
 0x29a   : > { %v621_v22 = vpop.permute.xlu0 %620  ;;  %902 = vmatpush3.bf16.msra.mxu1 %v654_v20  ;;  %v650_v23 = vsel %vm368_vm6, %v585_v17, %v593_v19 }
 0x29b   : > { %695 = vmatprep.subr.bf16.mxu0 %v650_v23  ;;  %903 = vmatprep.subr.bf16.mxu1 %v952_v11 }
 0x29c   : > { %696 = vmatpush1.bf16.msra.mxu0 %v646_v24  ;;  %v607_v26 = vpop.permute.xlu1 %606 }
 0x29d   : > { %v609_v28 = vsel %vm328_vm7, %v605_v4, %v607_v26  ;;  %v666_v29 = vsel %vm368_vm6, %v599_v0, %v607_v26 }
 0x29e   : > { %v611_v32 = vpop.permute.xlu0 %610  ;;  %904 = vmatpush3.bf16.msra.mxu1 %v666_v29  ;;  %v662_v35 = vsel %vm368_vm6, %v601_v27, %v609_v28 }
 0x29f   : > { %697 = vmatprep.subr.bf16.mxu0 %v662_v35  ;;  %905 = vmatprep.subr.bf16.mxu1 %v952_v11  ;;  %v616_v45 = vsel %vm337_vm8, %v611_v32, %v613_v14 }
 0x2a0   : > { %698 = vmatpush1.bf16.msra.mxu0 %v658_v36  ;;  %v623_v38 = vpop.permute.xlu1 %622 }
 0x2a1   : > { %v625_v3 = vsel %vm346_vm10, %v621_v22, %v623_v38  ;;  %v678_v41 = vsel %vm368_vm6, %v615_v10, %v623_v38 }
 0x2a2   : > { %v627_v42 = vpop.permute.xlu0 %626  ;;  %906 = vmatpush3.bf16.msra.mxu1 %v678_v41  ;;  %v674_v43 = vsel %vm368_vm6, %v617_v39, %v625_v3 }
 0x2a3   : > { %699 = vmatprep.subr.bf16.mxu0 %v674_v43  ;;  %907 = vmatprep.subr.bf16.mxu1 %v952_v11 }
 0x2a4   : > { %v619_v44 = vpop.permute.xlu1 %618 }
 0x2a5   : > { %v624_v46 = vsel %vm346_vm10, %v619_v44, %v621_v22 }
 0x2a6   : > { %v631_v47 = vpop.permute.xlu0 %630  ;;  %v670_v48 = vsel %vm368_vm6, %v616_v45, %v624_v46 }
 0x2a7   : > { %v691_v49 = vsel %vm368_vm6, %v631_v47, 0  ;;  %700 = vmatpush1.bf16.msra.mxu0 %v670_v48 }
 0x2a8   : > { %908 = vmatpush3.bf16.msra.mxu1 %v691_v49  ;;  %v629_v50 = vpop.permute.xlu1 %628 }
 0x2a9   : > { %v632_v11 = vsel %vm355_vm11, %v627_v42, %v629_v50  ;;  %v633_v52 = vsel %vm355_vm11, %v629_v50, %v631_v47 }
 0x2aa   : > { %v685_v53 = vsel %vm368_vm6, %v632_v11, 0  ;;  %874 = vmatprep.subr.msk.bf16.mxu0 %vm368_vm6, %v633_v52 }
 0x2ab   : > { %702 = vmatpush1.bf16.msra.mxu0 %v685_v53  ;;  %910 = vmatmul.mubr.msk.bf16.vlgmr.msra.gmra.mrb[4].mxu1 %vm680_vm15, %v564_v51 }
 0x2ae   : > { %875 = vmatmul.mubr.msk.bf16.vlgmr.msra.gmra.mrb[4].mxu0 %vm680_vm15, %v564_v51 }
 0x2b9   : > { %v778_v55 = vpop.permute.xlu1 %777 }
 0x37e   : > { %v768_v54 = vpop.f32.mrb[4].mxu1 }
 0x37f   : > { %v769_v56 = vadd.f32 %v768_v54, %v1112_v31  ;;  %v911_v57 = vpop.f32.mrb[5].mxu1 }
 0x380   : > { %v771_v58 = vpop.f32.mrb[6].mxu1 }
 0x381   : > { %v782_v59 = vadd.f32 %v778_v55, %v769_v56  ;;  %v727_v60 = vpop.f32.mrb[4].mxu0  ;;  %v912_v61 = vpop.f32.mrb[7].mxu1 }
 0x382   : > { %v728_v62 = vadd.f32 %v727_v60, %v1118_v34  ;;  %v729_v63 = vpop.f32.mrb[5].mxu0 }
 0x383   : > { %v785_v0 = vmax.f32 %v782_v59, 0.0  ;;  %v730_v1 = vadd.f32 %v729_v63, %v1120_v37  ;;  %v731_v2 = vpop.f32.mrb[6].mxu0 }
 0x384   : > { %v732_v4 = vpop.f32.mrb[7].mxu0  ;;  %v780_v5 = vadd.f32 %v778_v55, %v728_v62 }
 0x385   : > { %v781_v6 = vadd.f32 %v778_v55, %v730_v1  ;;  %v788_v7 = vmul.f32 %v785_v0, %v1122_v40 }
 0x386   : > { %v783_v31 = vmax.f32 %v780_v5, 0.0 }
 0x387   : > { %v784_v8 = vmax.f32 %v781_v6, 0.0  ;;  %796 = vrot.lane.b32.xlu1 %v788_v7, %s961_s17 }
 0x388   : > { %v786_v34 = vmul.f32 %v783_v31, %v1114_v18 }
 0x389   : > { %v787_v9 = vmul.f32 %v784_v8, %v1116_v33 }
 0x38b   : > { %794 = vrot.lane.b32.xlu0 %v787_v9, %s961_s17 }
 0x38f   : > { %792 = vrot.lane.b32.xlu0 %v786_v34, %s961_s17 }
 0x3f9   : > { %v797_v37 = vpop.permute.xlu1 %796 }
 0x3fd   : > { %v795_v10 = vpop.permute.xlu0 %794 }
 0x3fe   : > { %v799_v40 = vsel %vm554_vm13, %v795_v10, %v797_v37 }
 0x3ff   : > { %v804_v12 = vsel %vm561_vm14, %v799_v40, 0.0 }
 0x400   : > { %807 = vst [vmem:[%s251_s27 + $0x10] sm:$0xff] %v804_v12 }
 0x401   : > { %v793_v13 = vpop.permute.xlu0 %792 }
 0x402   : > { %v798_v33 = vsel %vm554_vm13, %v793_v13, %v795_v10  ;;  %v803_v14 = vsel %vm554_vm13, 0.0, %v793_v13 }
 0x403   : > { %805 = vst [vmem:[%s251_s27] sm:$0xff] %v803_v14  ;;  %806 = vst [vmem:[%s251_s27 + $0x8] sm:$0xff] %v798_v33 }
 0x404 PF: > { %s16_s21 = sadd.s32 1, %s947_s21  }
 0x405   : > { %p13_p4 = scmp.ge.s32.totalorder %s16_s21, 4  }
 0x407   :  { %15 = sbr.rel (!%p13_p4) target bundleno = 1 (0x1), region = 74 }

</bundles_post_ra>
